<compile_context>
chip_gen: v6e
topology: v6e:2x2x1
jax: 0.10.0
libtpu: 0.0.40
codegen_flags: <defaults>
</compile_context>

<pallas_src>
import math

import jax
import jax.numpy as jnp
from jax.experimental import pallas as pl
from jax.experimental.pallas import tpu as pltpu

BN_EPS = 1e-5


def _round_up(x, m):
    return ((x + m - 1) // m) * m


def _cdiv(a, b):
    return (a + b - 1) // b


def _patch_embed_kernel(x_ref, w_ref, b_ref, o_ref):
    # x_ref: (TM, K)  im2col row tile (bf16), streamed
    # w_ref: (K, N)   BN-folded conv weight (bf16), VMEM-resident across grid steps
    # b_ref: (1, N)   BN-folded bias (f32), VMEM-resident
    # o_ref: (TM, N)  output tile
    y = jnp.dot(x_ref[...], w_ref[...], preferred_element_type=jnp.float32)
    o_ref[...] = (y + b_ref[...]).astype(o_ref.dtype)


def _im2col_nhwc(x_nchw, kh, kw, stride, pad, dtype):
    """im2col with K ordering (kh, kw, cin) -> (B*Ho*Wo, KH*KW*Cin), built in `dtype`.

    Materialized exactly once (single concatenate); no K or M padding is added here.
    """
    B, C, H, W = x_nchw.shape
    Ho = (H + 2 * pad - kh) // stride + 1
    Wo = (W + 2 * pad - kw) // stride + 1
    xp = jnp.pad(jnp.transpose(x_nchw, (0, 2, 3, 1)).astype(dtype),
                 ((0, 0), (pad, pad), (pad, pad), (0, 0)))
    taps = []
    for i in range(kh):
        for j in range(kw):
            taps.append(xp[:, i:i + Ho * stride:stride, j:j + Wo * stride:stride, :])
    patches = jnp.concatenate(taps, axis=-1)          # (B, Ho, Wo, KH*KW*C)
    return patches.reshape(B * Ho * Wo, kh * kw * C), Ho, Wo


def _choose_tile_m(M, K, N, tile_m):
    TM = min(tile_m, _round_up(M, 16))
    # Conservative VMEM budget: 2x double-buffered bf16 input tiles + 2x double-buffered
    # output tiles. ~12 MiB stays under every generation's scoped default (v5e: 16 MiB),
    # so no vmem_limit override is needed.
    per_row = 2 * 2 * K + 2 * 4 * N
    cap = max(16, (12 * 1024 * 1024 // per_row) // 16 * 16)
    TM = min(TM, cap)
    # v7x has 2 TensorCores: keep >= 2 grid steps when there is enough work so the
    # "parallel" grid axis can actually be sharded across both cores.
    if M >= 512 and _cdiv(M, TM) < 2:
        TM = max(16, _round_up(_cdiv(M, 2), 16))
    return TM


def overlap_patch_embed(x_nchw, params, *, patch_size=7, stride=4,
                        compute_dtype=jnp.bfloat16, out_dtype=jnp.float32,
                        tile_m=1024, channels_last=False):
    """Forward pass of OverlapPatchEmbed. Returns (x_out, H, W).

    x_out is NCHW (module semantics) by default; channels_last=True returns
    (B, Ho, Wo, C) and skips the transpose pass. out_dtype=jnp.bfloat16 halves the
    output HBM traffic if the consumer tolerates it (accumulation stays f32 either way).
    """
    B, Cin, H, W = x_nchw.shape
    pad = patch_size // 2
    w = params["proj_weight"].astype(jnp.float32)      # (embed_dim, Cin, KH, KW)
    embed_dim = w.shape[0]

    # Fold conv bias + eval-mode BatchNorm into the GEMM weight/bias (exact algebra).
    scale = params["bn_weight"] * jax.lax.rsqrt(params["bn_running_var"] + BN_EPS)
    w_fold = w * scale[:, None, None, None]
    b_fold = params["bn_bias"] + (params["proj_bias"] - params["bn_running_mean"]) * scale

    patches, Ho, Wo = _im2col_nhwc(x_nchw, patch_size, patch_size, stride, pad,
                                   compute_dtype)
    M, K = patches.shape

    # (O, Cin, KH, KW) -> (KH, KW, Cin, O) -> (K, O): matches the (kh, kw, cin) order.
    w2d = jnp.transpose(w_fold, (2, 3, 1, 0)).reshape(K, embed_dim).astype(compute_dtype)
    bias = b_fold.astype(jnp.float32).reshape(1, embed_dim)

    TM = _choose_tile_m(M, K, embed_dim, tile_m)
    grid = (_cdiv(M, TM),)

    out2d = pl.pallas_call(
        _patch_embed_kernel,
        out_shape=jax.ShapeDtypeStruct((M, embed_dim), out_dtype),
        grid=grid,
        in_specs=[
            # Streamed im2col row tiles; last dim == full K extent (no HBM padding).
            pl.BlockSpec((TM, K), lambda i: (i, 0)),
            # Resident folded weight / bias (constant index_map).
            pl.BlockSpec((K, embed_dim), lambda i: (0, 0)),
            pl.BlockSpec((1, embed_dim), lambda i: (0, 0)),
        ],
        out_specs=pl.BlockSpec((TM, embed_dim), lambda i: (i, 0)),
        compiler_params=pltpu.CompilerParams(
            dimension_semantics=("parallel",)),
    )(patches, w2d, bias)

    out = out2d.reshape(B, Ho, Wo, embed_dim)   # free reshape (contiguous)
    if not channels_last:
        out = out.transpose(0, 3, 1, 2)          # NCHW to match the PyTorch module
    return out, Ho, Wo


def init_params(key, in_chans, embed_dim, patch_size):
    # Mirrors OverlapPatchEmbed._init_weights for Conv2d / BatchNorm2d.
    fan_out = patch_size * patch_size * embed_dim
    std = math.sqrt(2.0 / fan_out)
    k_w, k_m, k_v = jax.random.split(key, 3)
    proj_weight = std * jax.random.normal(
        k_w, (embed_dim, in_chans, patch_size, patch_size), dtype=jnp.float32)
    proj_bias = jnp.zeros((embed_dim,), jnp.float32)
    # BN affine: weight=1, bias=0 per _init_weights; deterministic non-trivial running
    # stats so the normalization path is actually exercised.
    bn_weight = jnp.ones((embed_dim,), jnp.float32)
    bn_bias = jnp.zeros((embed_dim,), jnp.float32)
    bn_running_mean = 0.1 * jax.random.normal(k_m, (embed_dim,), dtype=jnp.float32)
    bn_running_var = 1.0 + 0.1 * jax.random.uniform(k_v, (embed_dim,), dtype=jnp.float32)
    return dict(proj_weight=proj_weight, proj_bias=proj_bias,
                bn_weight=bn_weight, bn_bias=bn_bias,
                bn_running_mean=bn_running_mean, bn_running_var=bn_running_var)


def _reference(x_nchw, params, *, patch_size=7, stride=4):
    pad = patch_size // 2
    y = jax.lax.conv_general_dilated(
        x_nchw, params["proj_weight"],
        window_strides=(stride, stride),
        padding=((pad, pad), (pad, pad)),
        dimension_numbers=("NCHW", "OIHW", "NCHW"))
    y = y + params["proj_bias"][None, :, None, None]
    mean = params["bn_running_mean"][None, :, None, None]
    var = params["bn_running_var"][None, :, None, None]
    gamma = params["bn_weight"][None, :, None, None]
    beta = params["bn_bias"][None, :, None, None]
    return (y - mean) * jax.lax.rsqrt(var + BN_EPS) * gamma + beta


if __name__ == "__main__":
    B, Cin, H, W = 2, 4, 16, 16
    embed_dim, patch_size, stride = 32, 7, 4

    key = jax.random.PRNGKey(0)
    k_x, k_p = jax.random.split(key)
    x = jax.random.normal(k_x, (B, Cin, H, W), dtype=jnp.float32)
    params = init_params(k_p, Cin, embed_dim, patch_size)

    out, Ho, Wo = overlap_patch_embed(x, params, patch_size=patch_size, stride=stride)
    out = jax.block_until_ready(out)
    assert out.shape == (B, embed_dim, Ho, Wo), out.shape

    ref = _reference(x, params, patch_size=patch_size, stride=stride)
    # bf16 GEMM operands (f32 accumulation) -> loosened tolerance vs the f32 reference.
    assert jnp.allclose(out, ref, atol=3e-2, rtol=3e-2), float(jnp.abs(out - ref).max())

    # channels_last fast path (skips the NCHW transpose) must agree as well.
    out_cl, _, _ = overlap_patch_embed(x, params, patch_size=patch_size, stride=stride,
                                       channels_last=True)
    out_cl = jax.block_until_ready(out_cl)
    assert out_cl.shape == (B, Ho, Wo, embed_dim), out_cl.shape
    assert jnp.allclose(out_cl.transpose(0, 3, 1, 2), ref, atol=3e-2, rtol=3e-2), \
        float(jnp.abs(out_cl.transpose(0, 3, 1, 2) - ref).max())

    print("KERNEL_OK")
</pallas_src>

<mosaic_0001>
module attributes {stable_mosaic.version = 11 : i64} {
  func.func @_patch_embed_kernel(%arg0: i32, %arg1: memref<32x196xbf16, #tpu.memory_space<vmem>>, %arg2: memref<196x32xbf16, #tpu.memory_space<vmem>>, %arg3: memref<1x32xf32, #tpu.memory_space<vmem>>, %arg4: memref<32x32xf32, #tpu.memory_space<vmem>>) attributes {dimension_semantics = [#tpu.dimension_semantics<parallel>], iteration_bounds = array<i64: 1>, scalar_prefetch = 0 : i64, scratch_operands = 0 : i64, tpu.core_type = #tpu.core_type<tc>, window_params = [{transform_indices = @transform_0, window_bounds = array<i64: 32, 196>}, {pipeline_mode = #tpu.pipeline_mode<synchronous>, transform_indices = @transform_1, window_bounds = array<i64: 196, 32>}, {pipeline_mode = #tpu.pipeline_mode<synchronous>, transform_indices = @transform_2, window_bounds = array<i64: 1, 32>}, {transform_indices = @transform_3, window_bounds = array<i64: 32, 32>}]} {
    %c0 = arith.constant 0 : index
    %c0_0 = arith.constant 0 : index
    %0 = vector.load %arg1[%c0, %c0_0] : memref<32x196xbf16, #tpu.memory_space<vmem>>, vector<32x196xbf16>
    %c0_1 = arith.constant 0 : index
    %c0_2 = arith.constant 0 : index
    %1 = vector.load %arg2[%c0_1, %c0_2] : memref<196x32xbf16, #tpu.memory_space<vmem>>, vector<196x32xbf16>
    %cst = arith.constant dense<0.000000e+00> : vector<32x32xf32>
    %2 = tpu.matmul %0, %1, %cst {dimension_numbers = #tpu.dot_dimension_numbers<[1], [0], [0], [1], [0, 0, 1, 1], [], []>} : vector<32x196xbf16>, vector<196x32xbf16>, vector<32x32xf32> -> vector<32x32xf32>
    %c0_3 = arith.constant 0 : index
    %c0_4 = arith.constant 0 : index
    %3 = vector.load %arg3[%c0_3, %c0_4] : memref<1x32xf32, #tpu.memory_space<vmem>>, vector<1x32xf32>
    %4 = vector.broadcast %3 : vector<1x32xf32> to vector<32x32xf32>
    %5 = arith.addf %2, %4 : vector<32x32xf32>
    %c0_5 = arith.constant 0 : index
    %c0_6 = arith.constant 0 : index
    %6 = vector.load %arg4[%c0_5, %c0_6] : memref<32x32xf32, #tpu.memory_space<vmem>>, vector<32x32xf32>
    tpu.vector_store %arg4[%c0_5, %c0_6], %5 {strides = array<i32>} : memref<32x32xf32, #tpu.memory_space<vmem>>, vector<32x32xf32>,
    return
  }
  func.func @transform_0(%arg0: i32) -> (i32, i32) {
    %c0_i32 = arith.constant 0 : i32
    %c0_i32_0 = arith.constant 0 : i32
    return %arg0, %c0_i32 : i32, i32
  }
  func.func @transform_1(%arg0: i32) -> (i32, i32) {
    %c0_i32 = arith.constant 0 : i32
    %c0_i32_0 = arith.constant 0 : i32
    %c0_i32_1 = arith.constant 0 : i32
    return %c0_i32, %c0_i32_0 : i32, i32
  }
  func.func @transform_2(%arg0: i32) -> (i32, i32) {
    %c0_i32 = arith.constant 0 : i32
    %c0_i32_0 = arith.constant 0 : i32
    %c0_i32_1 = arith.constant 0 : i32
    return %c0_i32, %c0_i32_0 : i32, i32
  }
  func.func @transform_3(%arg0: i32) -> (i32, i32) {
    %c0_i32 = arith.constant 0 : i32
    %c0_i32_0 = arith.constant 0 : i32
    return %arg0, %c0_i32 : i32, i32
  }
}

</mosaic_0001>

<bundles_post_ra>
// kernel: tpu_custom_call.1
= control target key start
LH: loop header
LB: loop body
LE: loop exit
PB: predicated region body
PF: predicated region fallthrough
CT: control target
= control target key end

     0   :  { %v317_v1 = vmov 0   ;;  %vm145_vm0 = vcmask 556032   ;;  %s428_s0 = inlined_call_operand.vmem [shape: bf16[32,196], index: 0, kind: input, shape index: {}]   ;;  %s429_s1 = inlined_call_operand.vmem [shape: bf16[196,32], index: 1, kind: input, shape index: {}]   ;;  %s430_s2 = inlined_call_operand.vmem [shape: f32[1,32], index: 2, kind: input, shape index: {}]   ;;  %s431_s3 = inlined_call_operand.hbm [shape: f32[32,32], index: 3, kind: output, shape index: {}]  }
   0x1   :  { %v276_v0 = vld [vmem:[%s429_s1 + $0x38] sm:$0xff]   ;;  %156 = vmatprep.subr.bf16.mxu0 %v317_v1  ;;  %246 = vmatprep.subr.bf16.mxu1 %v317_v1  ;;  %v277_v2 = vld [vmem:[%s429_s1 + $0x30] sm:$0xff]   ;;  %v278_v3 = vld [vmem:[%s429_s1 + $0x28] sm:$0xff]  }
   0x2   :  { %157 = vmatpush1.bf16.msra.mxu0 %v276_v0  ;;  %259 = vmatpush1.bf16.msra.mxu1 %v276_v0  ;;  %v279_v4 = vld [vmem:[%s429_s1 + $0x20] sm:$0xff]   ;;  %v280_v6 = vld [vmem:[%s429_s1 + $0x18] sm:$0xff]  }
   0x3   :  { %158 = vmatprep.subr.bf16.mxu0 %v317_v1  ;;  %247 = vmatprep.subr.bf16.mxu1 %v317_v1  ;;  %v291_v5 = vld [vmem:[%s428_s0 + $0x4] ss:$8 sps:$4 sm:$0xff]   ;;  %v294_v7 = vld [vmem:[%s428_s0 + $0x14] ss:$8 sps:$4 sm:$0xff]  }
   0x6   :  { %159 = vmatpush1.bf16.msra.mxu0 %v277_v2  ;;  %260 = vmatpush1.bf16.msra.mxu1 %v277_v2 }
   0x7   :  { %160 = vmatprep.subr.bf16.mxu0 %v317_v1  ;;  %248 = vmatprep.subr.bf16.mxu1 %v317_v1 }
   0xa   :  { %161 = vmatpush1.bf16.msra.mxu0 %v278_v3  ;;  %261 = vmatpush1.bf16.msra.mxu1 %v278_v3 }
   0xb   :  { %162 = vmatprep.subr.bf16.mxu0 %v317_v1  ;;  %249 = vmatprep.subr.bf16.mxu1 %v317_v1 }
   0xe   :  { %163 = vmatpush1.bf16.msra.mxu0 %v279_v4  ;;  %262 = vmatpush1.bf16.msra.mxu1 %v279_v4 }
   0xf   :  { %164 = vmatprep.subr.bf16.mxu0 %v317_v1  ;;  %250 = vmatprep.subr.bf16.mxu1 %v317_v1 }
  0x10   :  { %8 = vsyncpa [#allocation3], 0  ;;  %244 = vmatprep.mubr.msk.bf16.mxu0 %vm145_vm0, %v291_v5  ;;  %245 = vmatprep.mubr.msk.bf16.mxu1 %vm145_vm0, %v294_v7  ;;  %v281_v8 = vld [vmem:[%s429_s1 + $0x10] sm:$0xff]   ;;  %v282_v9 = vld [vmem:[%s429_s1 + $0x8] sm:$0xff]   ;;  %vm152_vm1 = vcmask 1041408   ;;  %vm205_vm2 = vcmask 261120  }
  0x11   :  { %v283_v10 = vld [vmem:[%s429_s1] sm:$0xff]   ;;  %v285_v13 = vld [vmem:[%s429_s1 + $0x58] sm:$0xff]   ;;  %v286_v14 = vld [vmem:[%s429_s1 + $0x50] sm:$0xff]  }
  0x12   :  { %165 = vmatpush1.bf16.msra.mxu0 %v280_v6  ;;  %263 = vmatpush1.bf16.msra.mxu1 %v280_v6  ;;  %v284_v11 = vld [vmem:[%s429_s1 + $0x60] ss:$0 sps:$4 sm:$0x33]   ;;  %v287_v15 = vld [vmem:[%s429_s1 + $0x48] sm:$0xff]   ;;  %v292_v18 = vld [vmem:[%s428_s0 + $0x10] ss:$8 sps:$4 sm:$0xff]  }
  0x13   :  { %166 = vmatprep.subr.bf16.mxu0 %v317_v1  ;;  %251 = vmatprep.subr.bf16.mxu1 %v317_v1  ;;  %v154_v12 = vsel %vm152_vm1, %v284_v11, 0  ;;  %v288_v16 = vld [vmem:[%s429_s1 + $0x40] sm:$0xff]   ;;  %s318_s1 = smov [#allocation2]  }
  0x14   :  { %v289_v17 = vld [vmem:[%s428_s0] ss:$8 sps:$4 sm:$0xff]   ;;  %s215_s21 = sshll.u32 %s318_s1, 4  ;;  %s216_s21 = int_to_ptr.vmem [resolvable:$true] %s215_s21 }
  0x15   :  { %v226_v19 = vld [vmem:[%s430_s2] ss:$0 sm:$0xff]  ;;  %s295_s0 = scalar_lea.vmem %s216_s21, 512  ;;  %p300_p1 = scmp.lt.s32.totalorder %s216_s21, %s216_s21 }
  0x16   :  { %167 = vmatpush1.bf16.msra.mxu0 %v281_v8  ;;  %264 = vmatpush1.bf16.msra.mxu1 %v281_v8  ;;  %p296_p0 = scmp.ne.s32.totalorder %s216_s21, %s295_s0  ;;  %p301_p2 = scmp.lt.s32.totalorder %s295_s0, %s295_s0 }
  0x17   :  { %168 = vmatprep.subr.bf16.mxu0 %v317_v1  ;;  %252 = vmatprep.subr.bf16.mxu1 %v317_v1 }
  0x18   :  { %p302_p3 = por %p301_p2, %p300_p1 }
  0x1a   :  { %169 = vmatpush1.bf16.msra.mxu0 %v282_v9  ;;  %265 = vmatpush1.bf16.msra.mxu1 %v282_v9  ;;  %p303_p4 = pnand %p302_p3, %p296_p0 }
  0x1b   :  { %170 = vmatprep.subr.bf16.mxu0 %v317_v1  ;;  %253 = vmatprep.subr.bf16.mxu1 %v317_v1 }
  0x1e   :  { %171 = vmatpush1.bf16.msra.mxu0 %v283_v10  ;;  %266 = vmatpush1.bf16.msra.mxu1 %v283_v10 }
  0x1f   :  { %178 = vmatprep.subr.bf16.mxu0 %v317_v1  ;;  %254 = vmatprep.subr.bf16.mxu1 %v317_v1 }
  0x22   :  { %179 = vmatpush2.bf16.msra.mxu0 %v154_v12  ;;  %267 = vmatpush2.bf16.msra.mxu1 %v154_v12 }
  0x23   :  { %180 = vmatprep.subr.bf16.mxu0 %v317_v1  ;;  %255 = vmatprep.subr.bf16.mxu1 %v317_v1 }
  0x26   :  { %181 = vmatpush2.bf16.msra.mxu0 %v285_v13  ;;  %268 = vmatpush2.bf16.msra.mxu1 %v285_v13 }
  0x27   :  { %182 = vmatprep.subr.bf16.mxu0 %v317_v1  ;;  %256 = vmatprep.subr.bf16.mxu1 %v317_v1 }
  0x2a   :  { %183 = vmatpush2.bf16.msra.mxu0 %v286_v14  ;;  %269 = vmatpush2.bf16.msra.mxu1 %v286_v14 }
  0x2b   :  { %184 = vmatprep.subr.bf16.mxu0 %v317_v1  ;;  %257 = vmatprep.subr.bf16.mxu1 %v317_v1 }
  0x2e   :  { %185 = vmatpush2.bf16.msra.mxu0 %v287_v15  ;;  %270 = vmatpush2.bf16.msra.mxu1 %v287_v15 }
  0x2f   :  { %186 = vmatprep.subr.bf16.mxu0 %v317_v1  ;;  %258 = vmatprep.subr.bf16.mxu1 %v317_v1 }
  0x32   :  { %187 = vmatpush2.bf16.msra.mxu0 %v288_v16  ;;  %271 = vmatpush2.bf16.msra.mxu1 %v288_v16 }
  0x35   :  { %189 = vmatmul.mubr.bf16.vlgmr.msra.gmra.mxu0 %v289_v17  ;;  %197 = vmatmul.mubr.bf16.vlgmr.msra.gmra.mxu1 %v292_v18 }
  0xf5   :  { %v190_v20 = vpop.f32.mrf.mxu0  ;;  %v198_v21 = vpop.f32.mrf.mxu1 }
  0xf6   :  { %v191_v22 = vadd.f32 %v226_v19, %v190_v20  ;;  %v199_v23 = vadd.f32 %v226_v19, %v198_v21 }
  0xf7   :  { %v192_v24 = vpop.f32.mrf.mxu0  ;;  %v200_v25 = vpop.f32.mrf.mxu1 }
  0xf8   :  { %206 = vst.msk [vmem:[#allocation2] sm:$0xff] %vm205_vm2, %v191_v22  ;;  %208 = vst.msk [vmem:[#allocation2 + $0x10] sm:$0xff] %vm205_vm2, %v199_v23 }
  0xf9   :  { %v193_v26 = vpop.f32.mrf.mxu0  ;;  %v201_v27 = vpop.f32.mrf.mxu1 }
  0xfa   :  { %v194_v28 = vadd.f32 %v226_v19, %v193_v26  ;;  %v202_v29 = vadd.f32 %v226_v19, %v201_v27 }
  0xfb   :  { %v195_v30 = vpop.f32.mrf.mxu0  ;;  %v203_v31 = vpop.f32.mrf.mxu1 }
  0xfc   :  { %207 = vst.msk [vmem:[#allocation2 + $0x8] sm:$0xff] %vm205_vm2, %v194_v28  ;;  %209 = vst.msk [vmem:[#allocation2 + $0x18] sm:$0xff] %vm205_vm2, %v202_v29 }
  0xfd   :  { %306 = shalt.err (!%p303_p4)
}
  0xfe   :  { %s319_s2 = smov 128   ;;  %s320_s22 = smov 8  }
  0xff   :  { %221 = dma.vmem_to_hbm [thread:$0]  %s216_s21, 512, %s431_s3, [#allocation3], %s319_s2, %s319_s2, %s320_s22  }
 0x100   :  { %315 = dma.done.wait [#allocation3], 512  }
 0x101   :  { %316 = vsyncadd [#allocation3], 4294966784 }
 0x102   :  { %225 = vsyncpa [#allocation3], 1 }

</bundles_post_ra>
